<compile_context>
chip_gen: v7x
topology: tpu7x:2x2x1
jax: 0.10.0
libtpu: 0.0.40
codegen_flags: <defaults>
</compile_context>

<pallas_src>
import functools

import jax
import jax.numpy as jnp
import numpy as np
from jax import lax
from jax.experimental import pallas as pl
from jax.experimental.pallas import tpu as pltpu

LN_EPS = 1e-5


# ----------------------------- fused Pallas kernel --------------------------------


def _ln_relu(v, g, b):
    """LayerNorm over the channel (sublane) axis of a (C, P) slab, then ReLU (f32)."""
    mean = jnp.mean(v, axis=0, keepdims=True)
    var = jnp.mean((v - mean) ** 2, axis=0, keepdims=True)
    vhat = (v - mean) * lax.rsqrt(var + LN_EPS)
    return jnp.maximum(vhat * g + b, 0.0)


def _im2col(h, m_ref, shifts):
    """(C, P) -> (9*C, P) patch slab for a 3x3 / stride-1 / pad-1 conv.

    Tap t = ky*3 + kx is a lane roll of the flattened pixel axis by -(dy*W + dx),
    masked by the precomputed validity mask (zero padding). Rows are ordered
    tap-major / channel-minor so one MXU matmul against the reshaped HWIO weight
    computes the whole conv.
    """
    taps = []
    for t, s in enumerate(shifts):
        if s == 0:                       # centre tap: no shift, mask is all-ones
            taps.append(h)
            continue
        shifted = pltpu.roll(h, shift=s, axis=1)
        taps.append(shifted * m_ref[pl.ds(t, 1), :])
    return jnp.concatenate(taps, axis=0)


def preact_block_kernel(x_ref, g1_ref, b1_ref, w1_ref, g2_ref, b2_ref,
                        w2_ref, m_ref, out_ref, *, shifts):
    # x_ref: (Cin, HW) for one image (batch dim squeezed by the BlockSpec).
    x = x_ref[...].astype(jnp.float32)

    # relu1(norm1(x))
    h1 = _ln_relu(x, g1_ref[...], b1_ref[...])                     # (Cin, HW)

    # conv1: single im2col matmul, K = 9*Cin
    slab1 = _im2col(h1, m_ref, shifts)                             # (9*Cin, HW)
    c1 = jnp.dot(w1_ref[...], slab1,
                 preferred_element_type=jnp.float32)               # (Cout, HW)

    # relu2(norm2(.))
    h2 = _ln_relu(c1, g2_ref[...], b2_ref[...])                    # (Cout, HW)

    # conv2 + 1x1-conv shortcut folded into one matmul, K = 9*Cout + Cin
    slab2 = jnp.concatenate([_im2col(h2, m_ref, shifts), h1], axis=0)
    out = jnp.dot(w2_ref[...], slab2,
                  preferred_element_type=jnp.float32)              # (Cout, HW)

    out_ref[...] = out.astype(out_ref.dtype)


# ----------------------------- wrapper ---------------------------------------------


def preact_block_forward(x_nchw, g1, b1, w1, g2, b2, w2, wsc):
    """PreActBlock forward (layer_norm config, stride=1, shortcut = 1x1 conv).

    x_nchw: (N, Cin, H, W) -> (N, planes, H, W).  w1/w2 are HWIO, wsc is (Cin, Cout).
    """
    N, Cin, H, W = x_nchw.shape
    Cout = w1.shape[-1]
    HW = H * W

    # Layout plumbing (outside the kernel): NCHW with (H, W) flattened is already
    # the lane-dense (channels on sublanes, pixels on lanes) layout the kernel wants.
    x_cp = x_nchw.reshape(N, Cin, HW)

    # im2col weight matrices (K ordered tap-major, channel-minor).
    w1_mat = jnp.transpose(w1.reshape(9 * Cin, Cout))                      # (Cout, 9*Cin)
    w2_mat = jnp.transpose(
        jnp.concatenate([w2.reshape(9 * Cout, Cout), wsc], axis=0))        # (Cout, 9*Cout+Cin)

    # Per-tap validity masks (zero padding) and lane-roll amounts, built host-side.
    yy, xx = np.divmod(np.arange(HW, dtype=np.int64), W)
    masks, shifts = [], []
    for ky in range(3):
        for kx in range(3):
            dy, dx = ky - 1, kx - 1
            valid = (yy + dy >= 0) & (yy + dy < H) & (xx + dx >= 0) & (xx + dx < W)
            masks.append(valid)
            shifts.append(int(-(dy * W + dx)) % HW)
    masks = jnp.asarray(np.stack(masks, axis=0).astype(np.float32))        # (9, HW)

    g1c = g1.reshape(Cin, 1).astype(jnp.float32)
    b1c = b1.reshape(Cin, 1).astype(jnp.float32)
    g2c = g2.reshape(Cout, 1).astype(jnp.float32)
    b2c = b2.reshape(Cout, 1).astype(jnp.float32)

    kernel = functools.partial(preact_block_kernel, shifts=tuple(shifts))

    out_cp = pl.pallas_call(
        kernel,
        out_shape=jax.ShapeDtypeStruct((N, Cout, HW), x_nchw.dtype),
        grid=(N,),
        in_specs=[
            pl.BlockSpec((None, Cin, HW), lambda n: (n, 0, 0)),            # x (per image)
            pl.BlockSpec((Cin, 1), lambda n: (0, 0)),                      # gamma1
            pl.BlockSpec((Cin, 1), lambda n: (0, 0)),                      # beta1
            pl.BlockSpec((Cout, 9 * Cin), lambda n: (0, 0)),               # conv1 weight
            pl.BlockSpec((Cout, 1), lambda n: (0, 0)),                     # gamma2
            pl.BlockSpec((Cout, 1), lambda n: (0, 0)),                     # beta2
            pl.BlockSpec((Cout, 9 * Cout + Cin), lambda n: (0, 0)),        # conv2 + shortcut
            pl.BlockSpec((9, HW), lambda n: (0, 0)),                       # tap masks
        ],
        out_specs=pl.BlockSpec((None, Cout, HW), lambda n: (n, 0, 0)),
        compiler_params=pltpu.CompilerParams(
            dimension_semantics=("parallel",)),    # 2 TensorCores on v7x; no-op on v5e/v6e
    )(x_cp, g1c, b1c, w1_mat, g2c, b2c, w2_mat, masks)

    return out_cp.reshape(N, Cout, H, W)


# ----------------------------- pure-JAX reference ----------------------------------


def ref_forward(x_nchw, g1, b1, w1, g2, b2, w2, wsc):
    x = jnp.transpose(x_nchw, (0, 2, 3, 1))

    def ln(v, g, b):
        m = v.mean(-1, keepdims=True)
        var = ((v - m) ** 2).mean(-1, keepdims=True)
        return (v - m) / jnp.sqrt(var + LN_EPS) * g + b

    def conv(v, w):
        return lax.conv_general_dilated(
            v, w, window_strides=(1, 1), padding="SAME",
            dimension_numbers=("NHWC", "HWIO", "NHWC"),
            precision=lax.Precision.HIGHEST)

    h1 = jax.nn.relu(ln(x, g1, b1))
    shortcut = jnp.einsum("nhwc,cd->nhwd", h1, wsc,
                          precision=lax.Precision.HIGHEST)
    c1 = conv(h1, w1)
    h2 = jax.nn.relu(ln(c1, g2, b2))
    out = conv(h2, w2) + shortcut
    return jnp.transpose(out, (0, 3, 1, 2))


# ----------------------------------- main ------------------------------------------


if __name__ == "__main__":
    key = jax.random.PRNGKey(0)
    ks = jax.random.split(key, 8)

    N, Cin, H, W = 2, 4, 16, 16
    planes = 8  # in_planes != planes -> 1x1-conv shortcut branch active

    x = jax.random.normal(ks[0], (N, Cin, H, W), jnp.float32)
    g1 = 1.0 + 0.1 * jax.random.normal(ks[1], (Cin,), jnp.float32)
    b1 = 0.1 * jax.random.normal(ks[2], (Cin,), jnp.float32)
    w1 = 0.1 * jax.random.normal(ks[3], (3, 3, Cin, planes), jnp.float32)   # HWIO
    g2 = 1.0 + 0.1 * jax.random.normal(ks[4], (planes,), jnp.float32)
    b2 = 0.1 * jax.random.normal(ks[5], (planes,), jnp.float32)
    w2 = 0.1 * jax.random.normal(ks[6], (3, 3, planes, planes), jnp.float32)
    wsc = 0.1 * jax.random.normal(ks[7], (Cin, planes), jnp.float32)        # 1x1 conv

    out = preact_block_forward(x, g1, b1, w1, g2, b2, w2, wsc)
    out = jax.block_until_ready(out)

    assert out.shape == (N, planes, H, W), out.shape

    ref = ref_forward(x, g1, b1, w1, g2, b2, w2, wsc)
    err = float(jnp.max(jnp.abs(out - ref)))
    assert err < 1e-2, f"max abs error vs reference: {err}"

    print("KERNEL_OK")
</pallas_src>

<mosaic_0001>
module attributes {stable_mosaic.version = 11 : i64} {
  func.func @preact_block_kernel(%arg0: i32, %arg1: memref<1x4x256xf32, #tpu.memory_space<vmem>>, %arg2: memref<4x1xf32, #tpu.memory_space<vmem>>, %arg3: memref<4x1xf32, #tpu.memory_space<vmem>>, %arg4: memref<8x36xf32, #tpu.memory_space<vmem>>, %arg5: memref<8x1xf32, #tpu.memory_space<vmem>>, %arg6: memref<8x1xf32, #tpu.memory_space<vmem>>, %arg7: memref<8x76xf32, #tpu.memory_space<vmem>>, %arg8: memref<9x256xf32, #tpu.memory_space<vmem>>, %arg9: memref<1x8x256xf32, #tpu.memory_space<vmem>>) attributes {dimension_semantics = [#tpu.dimension_semantics<parallel>], iteration_bounds = array<i64: 2>, scalar_prefetch = 0 : i64, scratch_operands = 0 : i64, tpu.core_type = #tpu.core_type<tc>, window_params = [{transform_indices = @transform_0, window_bounds = array<i64: 1, 4, 256>}, {pipeline_mode = #tpu.pipeline_mode<synchronous>, transform_indices = @transform_1, window_bounds = array<i64: 4, 1>}, {pipeline_mode = #tpu.pipeline_mode<synchronous>, transform_indices = @transform_2, window_bounds = array<i64: 4, 1>}, {pipeline_mode = #tpu.pipeline_mode<synchronous>, transform_indices = @transform_3, window_bounds = array<i64: 8, 36>}, {pipeline_mode = #tpu.pipeline_mode<synchronous>, transform_indices = @transform_4, window_bounds = array<i64: 8, 1>}, {pipeline_mode = #tpu.pipeline_mode<synchronous>, transform_indices = @transform_5, window_bounds = array<i64: 8, 1>}, {pipeline_mode = #tpu.pipeline_mode<synchronous>, transform_indices = @transform_6, window_bounds = array<i64: 8, 76>}, {pipeline_mode = #tpu.pipeline_mode<synchronous>, transform_indices = @transform_7, window_bounds = array<i64: 9, 256>}, {transform_indices = @transform_8, window_bounds = array<i64: 1, 8, 256>}]} {
    %c0 = arith.constant 0 : index
    %c0_0 = arith.constant 0 : index
    %c0_1 = arith.constant 0 : index
    %0 = vector.load %arg1[%c0, %c0_0, %c0_1] : memref<1x4x256xf32, #tpu.memory_space<vmem>>, vector<1x4x256xf32>
    %1 = vector.shape_cast %0 : vector<1x4x256xf32> to vector<4x256xf32>
    %c0_2 = arith.constant 0 : index
    %c0_3 = arith.constant 0 : index
    %2 = vector.load %arg2[%c0_2, %c0_3] : memref<4x1xf32, #tpu.memory_space<vmem>>, vector<4x1xf32>
    %c0_4 = arith.constant 0 : index
    %c0_5 = arith.constant 0 : index
    %3 = vector.load %arg3[%c0_4, %c0_5] : memref<4x1xf32, #tpu.memory_space<vmem>>, vector<4x1xf32>
    %cst = arith.constant dense<0.000000e+00> : vector<256xf32>
    %4 = vector.multi_reduction <add>, %1, %cst [0] : vector<4x256xf32> to vector<256xf32>
    %5 = vector.shape_cast %4 : vector<256xf32> to vector<1x256xf32>
    %cst_6 = arith.constant 4.000000e+00 : f32
    %6 = vector.broadcast %cst_6 : f32 to vector<1x256xf32>
    %7 = arith.divf %5, %6 : vector<1x256xf32>
    %8 = vector.broadcast %7 : vector<1x256xf32> to vector<4x256xf32>
    %9 = arith.subf %1, %8 : vector<4x256xf32>
    %10 = arith.mulf %9, %9 : vector<4x256xf32>
    %cst_7 = arith.constant dense<0.000000e+00> : vector<256xf32>
    %11 = vector.multi_reduction <add>, %10, %cst_7 [0] : vector<4x256xf32> to vector<256xf32>
    %12 = vector.shape_cast %11 : vector<256xf32> to vector<1x256xf32>
    %cst_8 = arith.constant 4.000000e+00 : f32
    %13 = vector.broadcast %cst_8 : f32 to vector<1x256xf32>
    %14 = arith.divf %12, %13 : vector<1x256xf32>
    %15 = vector.broadcast %7 : vector<1x256xf32> to vector<4x256xf32>
    %16 = arith.subf %1, %15 : vector<4x256xf32>
    %cst_9 = arith.constant 9.99999974E-6 : f32
    %17 = vector.broadcast %cst_9 : f32 to vector<1x256xf32>
    %18 = arith.addf %14, %17 : vector<1x256xf32>
    %19 = math.rsqrt %18 : vector<1x256xf32>
    %20 = vector.broadcast %19 : vector<1x256xf32> to vector<4x256xf32>
    %21 = arith.mulf %16, %20 : vector<4x256xf32>
    %22 = vector.broadcast %2 : vector<4x1xf32> to vector<4x256xf32>
    %23 = arith.mulf %21, %22 : vector<4x256xf32>
    %24 = vector.broadcast %3 : vector<4x1xf32> to vector<4x256xf32>
    %25 = arith.addf %23, %24 : vector<4x256xf32>
    %cst_10 = arith.constant 0.000000e+00 : f32
    %26 = vector.broadcast %cst_10 : f32 to vector<4x256xf32>
    %27 = arith.maximumf %25, %26 : vector<4x256xf32>
    %c17_i32 = arith.constant 17 : i32
    %28 = tpu.dynamic_rotate %27 by %c17_i32 dim 1 : vector<4x256xf32>, i32 -> vector<4x256xf32>
    %c0_11 = arith.constant 0 : index
    %c0_12 = arith.constant 0 : index
    %29 = vector.load %arg8[%c0_11, %c0_12] : memref<9x256xf32, #tpu.memory_space<vmem>>, vector<1x256xf32>
    %30 = vector.broadcast %29 : vector<1x256xf32> to vector<4x256xf32>
    %31 = arith.mulf %28, %30 : vector<4x256xf32>
    %c16_i32 = arith.constant 16 : i32
    %32 = tpu.dynamic_rotate %27 by %c16_i32 dim 1 : vector<4x256xf32>, i32 -> vector<4x256xf32>
    %c1 = arith.constant 1 : index
    %c0_13 = arith.constant 0 : index
    %33 = vector.load %arg8[%c1, %c0_13] : memref<9x256xf32, #tpu.memory_space<vmem>>, vector<1x256xf32>
    %34 = vector.broadcast %33 : vector<1x256xf32> to vector<4x256xf32>
    %35 = arith.mulf %32, %34 : vector<4x256xf32>
    %c15_i32 = arith.constant 15 : i32
    %36 = tpu.dynamic_rotate %27 by %c15_i32 dim 1 : vector<4x256xf32>, i32 -> vector<4x256xf32>
    %c2 = arith.constant 2 : index
    %c0_14 = arith.constant 0 : index
    %37 = vector.load %arg8[%c2, %c0_14] : memref<9x256xf32, #tpu.memory_space<vmem>>, vector<1x256xf32>
    %38 = vector.broadcast %37 : vector<1x256xf32> to vector<4x256xf32>
    %39 = arith.mulf %36, %38 : vector<4x256xf32>
    %c1_i32 = arith.constant 1 : i32
    %40 = tpu.dynamic_rotate %27 by %c1_i32 dim 1 : vector<4x256xf32>, i32 -> vector<4x256xf32>
    %c3 = arith.constant 3 : index
    %c0_15 = arith.constant 0 : index
    %41 = vector.load %arg8[%c3, %c0_15] : memref<9x256xf32, #tpu.memory_space<vmem>>, vector<1x256xf32>
    %42 = vector.broadcast %41 : vector<1x256xf32> to vector<4x256xf32>
    %43 = arith.mulf %40, %42 : vector<4x256xf32>
    %c255_i32 = arith.constant 255 : i32
    %44 = tpu.dynamic_rotate %27 by %c255_i32 dim 1 : vector<4x256xf32>, i32 -> vector<4x256xf32>
    %c5 = arith.constant 5 : index
    %c0_16 = arith.constant 0 : index
    %45 = vector.load %arg8[%c5, %c0_16] : memref<9x256xf32, #tpu.memory_space<vmem>>, vector<1x256xf32>
    %46 = vector.broadcast %45 : vector<1x256xf32> to vector<4x256xf32>
    %47 = arith.mulf %44, %46 : vector<4x256xf32>
    %c241_i32 = arith.constant 241 : i32
    %48 = tpu.dynamic_rotate %27 by %c241_i32 dim 1 : vector<4x256xf32>, i32 -> vector<4x256xf32>
    %c6 = arith.constant 6 : index
    %c0_17 = arith.constant 0 : index
    %49 = vector.load %arg8[%c6, %c0_17] : memref<9x256xf32, #tpu.memory_space<vmem>>, vector<1x256xf32>
    %50 = vector.broadcast %49 : vector<1x256xf32> to vector<4x256xf32>
    %51 = arith.mulf %48, %50 : vector<4x256xf32>
    %c240_i32 = arith.constant 240 : i32
    %52 = tpu.dynamic_rotate %27 by %c240_i32 dim 1 : vector<4x256xf32>, i32 -> vector<4x256xf32>
    %c7 = arith.constant 7 : index
    %c0_18 = arith.constant 0 : index
    %53 = vector.load %arg8[%c7, %c0_18] : memref<9x256xf32, #tpu.memory_space<vmem>>, vector<1x256xf32>
    %54 = vector.broadcast %53 : vector<1x256xf32> to vector<4x256xf32>
    %55 = arith.mulf %52, %54 : vector<4x256xf32>
    %c239_i32 = arith.constant 239 : i32
    %56 = tpu.dynamic_rotate %27 by %c239_i32 dim 1 : vector<4x256xf32>, i32 -> vector<4x256xf32>
    %c8 = arith.constant 8 : index
    %c0_19 = arith.constant 0 : index
    %57 = vector.load %arg8[%c8, %c0_19] : memref<9x256xf32, #tpu.memory_space<vmem>>, vector<1x256xf32>
    %58 = vector.broadcast %57 : vector<1x256xf32> to vector<4x256xf32>
    %59 = arith.mulf %56, %58 : vector<4x256xf32>
    %60 = tpu.concatenate %31, %35, %39, %43, %27, %47, %51, %55, %59 in 0 : vector<4x256xf32>, vector<4x256xf32>, vector<4x256xf32>, vector<4x256xf32>, vector<4x256xf32>, vector<4x256xf32>, vector<4x256xf32>, vector<4x256xf32>, vector<4x256xf32> -> vector<36x256xf32>
    %c0_20 = arith.constant 0 : index
    %c0_21 = arith.constant 0 : index
    %61 = vector.load %arg4[%c0_20, %c0_21] : memref<8x36xf32, #tpu.memory_space<vmem>>, vector<8x36xf32>
    %cst_22 = arith.constant dense<0.000000e+00> : vector<8x256xf32>
    %62 = tpu.matmul %61, %60, %cst_22 {dimension_numbers = #tpu.dot_dimension_numbers<[1], [0], [0], [1], [0, 0, 1, 1], [], []>} : vector<8x36xf32>, vector<36x256xf32>, vector<8x256xf32> -> vector<8x256xf32>
    %c0_23 = arith.constant 0 : index
    %c0_24 = arith.constant 0 : index
    %63 = vector.load %arg5[%c0_23, %c0_24] : memref<8x1xf32, #tpu.memory_space<vmem>>, vector<8x1xf32>
    %c0_25 = arith.constant 0 : index
    %c0_26 = arith.constant 0 : index
    %64 = vector.load %arg6[%c0_25, %c0_26] : memref<8x1xf32, #tpu.memory_space<vmem>>, vector<8x1xf32>
    %cst_27 = arith.constant dense<0.000000e+00> : vector<256xf32>
    %65 = vector.multi_reduction <add>, %62, %cst_27 [0] : vector<8x256xf32> to vector<256xf32>
    %66 = vector.shape_cast %65 : vector<256xf32> to vector<1x256xf32>
    %cst_28 = arith.constant 8.000000e+00 : f32
    %67 = vector.broadcast %cst_28 : f32 to vector<1x256xf32>
    %68 = arith.divf %66, %67 : vector<1x256xf32>
    %69 = vector.broadcast %68 : vector<1x256xf32> to vector<8x256xf32>
    %70 = arith.subf %62, %69 : vector<8x256xf32>
    %71 = arith.mulf %70, %70 : vector<8x256xf32>
    %cst_29 = arith.constant dense<0.000000e+00> : vector<256xf32>
    %72 = vector.multi_reduction <add>, %71, %cst_29 [0] : vector<8x256xf32> to vector<256xf32>
    %73 = vector.shape_cast %72 : vector<256xf32> to vector<1x256xf32>
    %cst_30 = arith.constant 8.000000e+00 : f32
    %74 = vector.broadcast %cst_30 : f32 to vector<1x256xf32>
    %75 = arith.divf %73, %74 : vector<1x256xf32>
    %76 = vector.broadcast %68 : vector<1x256xf32> to vector<8x256xf32>
    %77 = arith.subf %62, %76 : vector<8x256xf32>
    %cst_31 = arith.constant 9.99999974E-6 : f32
    %78 = vector.broadcast %cst_31 : f32 to vector<1x256xf32>
    %79 = arith.addf %75, %78 : vector<1x256xf32>
    %80 = math.rsqrt %79 : vector<1x256xf32>
    %81 = vector.broadcast %80 : vector<1x256xf32> to vector<8x256xf32>
    %82 = arith.mulf %77, %81 : vector<8x256xf32>
    %83 = vector.broadcast %63 : vector<8x1xf32> to vector<8x256xf32>
    %84 = arith.mulf %82, %83 : vector<8x256xf32>
    %85 = vector.broadcast %64 : vector<8x1xf32> to vector<8x256xf32>
    %86 = arith.addf %84, %85 : vector<8x256xf32>
    %cst_32 = arith.constant 0.000000e+00 : f32
    %87 = vector.broadcast %cst_32 : f32 to vector<8x256xf32>
    %88 = arith.maximumf %86, %87 : vector<8x256xf32>
    %c17_i32_33 = arith.constant 17 : i32
    %89 = tpu.dynamic_rotate %88 by %c17_i32_33 dim 1 : vector<8x256xf32>, i32 -> vector<8x256xf32>
    %c0_34 = arith.constant 0 : index
    %c0_35 = arith.constant 0 : index
    %90 = vector.load %arg8[%c0_34, %c0_35] : memref<9x256xf32, #tpu.memory_space<vmem>>, vector<1x256xf32>
    %91 = vector.broadcast %90 : vector<1x256xf32> to vector<8x256xf32>
    %92 = arith.mulf %89, %91 : vector<8x256xf32>
    %c16_i32_36 = arith.constant 16 : i32
    %93 = tpu.dynamic_rotate %88 by %c16_i32_36 dim 1 : vector<8x256xf32>, i32 -> vector<8x256xf32>
    %c1_37 = arith.constant 1 : index
    %c0_38 = arith.constant 0 : index
    %94 = vector.load %arg8[%c1_37, %c0_38] : memref<9x256xf32, #tpu.memory_space<vmem>>, vector<1x256xf32>
    %95 = vector.broadcast %94 : vector<1x256xf32> to vector<8x256xf32>
    %96 = arith.mulf %93, %95 : vector<8x256xf32>
    %c15_i32_39 = arith.constant 15 : i32
    %97 = tpu.dynamic_rotate %88 by %c15_i32_39 dim 1 : vector<8x256xf32>, i32 -> vector<8x256xf32>
    %c2_40 = arith.constant 2 : index
    %c0_41 = arith.constant 0 : index
    %98 = vector.load %arg8[%c2_40, %c0_41] : memref<9x256xf32, #tpu.memory_space<vmem>>, vector<1x256xf32>
    %99 = vector.broadcast %98 : vector<1x256xf32> to vector<8x256xf32>
    %100 = arith.mulf %97, %99 : vector<8x256xf32>
    %c1_i32_42 = arith.constant 1 : i32
    %101 = tpu.dynamic_rotate %88 by %c1_i32_42 dim 1 : vector<8x256xf32>, i32 -> vector<8x256xf32>
    %c3_43 = arith.constant 3 : index
    %c0_44 = arith.constant 0 : index
    %102 = vector.load %arg8[%c3_43, %c0_44] : memref<9x256xf32, #tpu.memory_space<vmem>>, vector<1x256xf32>
    %103 = vector.broadcast %102 : vector<1x256xf32> to vector<8x256xf32>
    %104 = arith.mulf %101, %103 : vector<8x256xf32>
    %c255_i32_45 = arith.constant 255 : i32
    %105 = tpu.dynamic_rotate %88 by %c255_i32_45 dim 1 : vector<8x256xf32>, i32 -> vector<8x256xf32>
    %c5_46 = arith.constant 5 : index
    %c0_47 = arith.constant 0 : index
    %106 = vector.load %arg8[%c5_46, %c0_47] : memref<9x256xf32, #tpu.memory_space<vmem>>, vector<1x256xf32>
    %107 = vector.broadcast %106 : vector<1x256xf32> to vector<8x256xf32>
    %108 = arith.mulf %105, %107 : vector<8x256xf32>
    %c241_i32_48 = arith.constant 241 : i32
    %109 = tpu.dynamic_rotate %88 by %c241_i32_48 dim 1 : vector<8x256xf32>, i32 -> vector<8x256xf32>
    %c6_49 = arith.constant 6 : index
    %c0_50 = arith.constant 0 : index
    %110 = vector.load %arg8[%c6_49, %c0_50] : memref<9x256xf32, #tpu.memory_space<vmem>>, vector<1x256xf32>
    %111 = vector.broadcast %110 : vector<1x256xf32> to vector<8x256xf32>
    %112 = arith.mulf %109, %111 : vector<8x256xf32>
    %c240_i32_51 = arith.constant 240 : i32
    %113 = tpu.dynamic_rotate %88 by %c240_i32_51 dim 1 : vector<8x256xf32>, i32 -> vector<8x256xf32>
    %c7_52 = arith.constant 7 : index
    %c0_53 = arith.constant 0 : index
    %114 = vector.load %arg8[%c7_52, %c0_53] : memref<9x256xf32, #tpu.memory_space<vmem>>, vector<1x256xf32>
    %115 = vector.broadcast %114 : vector<1x256xf32> to vector<8x256xf32>
    %116 = arith.mulf %113, %115 : vector<8x256xf32>
    %c239_i32_54 = arith.constant 239 : i32
    %117 = tpu.dynamic_rotate %88 by %c239_i32_54 dim 1 : vector<8x256xf32>, i32 -> vector<8x256xf32>
    %c8_55 = arith.constant 8 : index
    %c0_56 = arith.constant 0 : index
    %118 = vector.load %arg8[%c8_55, %c0_56] : memref<9x256xf32, #tpu.memory_space<vmem>>, vector<1x256xf32>
    %119 = vector.broadcast %118 : vector<1x256xf32> to vector<8x256xf32>
    %120 = arith.mulf %117, %119 : vector<8x256xf32>
    %121 = tpu.concatenate %92, %96, %100, %104, %88, %108, %112, %116, %120 in 0 : vector<8x256xf32>, vector<8x256xf32>, vector<8x256xf32>, vector<8x256xf32>, vector<8x256xf32>, vector<8x256xf32>, vector<8x256xf32>, vector<8x256xf32>, vector<8x256xf32> -> vector<72x256xf32>
    %122 = tpu.concatenate %121, %27 in 0 : vector<72x256xf32>, vector<4x256xf32> -> vector<76x256xf32>
    %c0_57 = arith.constant 0 : index
    %c0_58 = arith.constant 0 : index
    %123 = vector.load %arg7[%c0_57, %c0_58] : memref<8x76xf32, #tpu.memory_space<vmem>>, vector<8x76xf32>
    %cst_59 = arith.constant dense<0.000000e+00> : vector<8x256xf32>
    %124 = tpu.matmul %123, %122, %cst_59 {dimension_numbers = #tpu.dot_dimension_numbers<[1], [0], [0], [1], [0, 0, 1, 1], [], []>} : vector<8x76xf32>, vector<76x256xf32>, vector<8x256xf32> -> vector<8x256xf32>
    %c0_60 = arith.constant 0 : index
    %c0_61 = arith.constant 0 : index
    %c0_62 = arith.constant 0 : index
    %125 = vector.load %arg9[%c0_60, %c0_61, %c0_62] : memref<1x8x256xf32, #tpu.memory_space<vmem>>, vector<1x8x256xf32>
    %126 = vector.shape_cast %125 : vector<1x8x256xf32> to vector<8x256xf32>
    %127 = vector.shape_cast %124 : vector<8x256xf32> to vector<1x8x256xf32>
    tpu.vector_store %arg9[%c0_60, %c0_61, %c0_62], %127 {strides = array<i32>} : memref<1x8x256xf32, #tpu.memory_space<vmem>>, vector<1x8x256xf32>,
    return
  }
  func.func @transform_0(%arg0: i32) -> (i32, i32, i32) {
    %c0_i32 = arith.constant 0 : i32
    %c0_i32_0 = arith.constant 0 : i32
    %c0_i32_1 = arith.constant 0 : i32
    return %arg0, %c0_i32, %c0_i32_0 : i32, i32, i32
  }
  func.func @transform_1(%arg0: i32) -> (i32, i32) {
    %c0_i32 = arith.constant 0 : i32
    %c0_i32_0 = arith.constant 0 : i32
    %c0_i32_1 = arith.constant 0 : i32
    return %c0_i32, %c0_i32_0 : i32, i32
  }
  func.func @transform_2(%arg0: i32) -> (i32, i32) {
    %c0_i32 = arith.constant 0 : i32
    %c0_i32_0 = arith.constant 0 : i32
    %c0_i32_1 = arith.constant 0 : i32
    return %c0_i32, %c0_i32_0 : i32, i32
  }
  func.func @transform_3(%arg0: i32) -> (i32, i32) {
    %c0_i32 = arith.constant 0 : i32
    %c0_i32_0 = arith.constant 0 : i32
    %c0_i32_1 = arith.constant 0 : i32
    return %c0_i32, %c0_i32_0 : i32, i32
  }
  func.func @transform_4(%arg0: i32) -> (i32, i32) {
    %c0_i32 = arith.constant 0 : i32
    %c0_i32_0 = arith.constant 0 : i32
    %c0_i32_1 = arith.constant 0 : i32
    return %c0_i32, %c0_i32_0 : i32, i32
  }
  func.func @transform_5(%arg0: i32) -> (i32, i32) {
    %c0_i32 = arith.constant 0 : i32
    %c0_i32_0 = arith.constant 0 : i32
    %c0_i32_1 = arith.constant 0 : i32
    return %c0_i32, %c0_i32_0 : i32, i32
  }
  func.func @transform_6(%arg0: i32) -> (i32, i32) {
    %c0_i32 = arith.constant 0 : i32
    %c0_i32_0 = arith.constant 0 : i32
    %c0_i32_1 = arith.constant 0 : i32
    return %c0_i32, %c0_i32_0 : i32, i32
  }
  func.func @transform_7(%arg0: i32) -> (i32, i32) {
    %c0_i32 = arith.constant 0 : i32
    %c0_i32_0 = arith.constant 0 : i32
    %c0_i32_1 = arith.constant 0 : i32
    return %c0_i32, %c0_i32_0 : i32, i32
  }
  func.func @transform_8(%arg0: i32) -> (i32, i32, i32) {
    %c0_i32 = arith.constant 0 : i32
    %c0_i32_0 = arith.constant 0 : i32
    %c0_i32_1 = arith.constant 0 : i32
    return %arg0, %c0_i32, %c0_i32_0 : i32, i32, i32
  }
}

</mosaic_0001>

<bundles_post_ra>
// kernel: tpu_custom_call.1
= control target key start
LH: loop header
LB: loop body
LE: loop exit
PB: predicated region body
PF: predicated region fallthrough
CT: control target
= control target key end

     0   :  { %13 = vsyncpa [#allocation3], 0  ;;  %s1790_s0 = inlined_call_operand.vmem [shape: f32[2,4,256], index: 0, kind: input, shape index: {}]   ;;  %s1791_s1 = inlined_call_operand.vmem [shape: f32[4,1], index: 1, kind: input, shape index: {}]   ;;  %s1792_s2 = inlined_call_operand.vmem [shape: f32[4,1], index: 2, kind: input, shape index: {}]   ;;  %s1793_s3 = inlined_call_operand.hbm [shape: f32[8,36], index: 3, kind: input, shape index: {}]   ;;  %s1794_s4 = inlined_call_operand.vmem [shape: f32[8,1], index: 4, kind: input, shape index: {}]   ;;  %s1795_s5 = inlined_call_operand.vmem [shape: f32[8,1], index: 5, kind: input, shape index: {}]   ;;  %s1796_s6 = inlined_call_operand.hbm [shape: f32[8,76], index: 6, kind: input, shape index: {}]   ;;  %s1797_s7 = inlined_call_operand.vmem [shape: f32[9,256], index: 7, kind: input, shape index: {}]   ;;  %s1798_s8 = inlined_call_operand.hbm [shape: f32[2,8,256], index: 8, kind: output, shape index: {}]  }
   0x1   :  { %14 = vsyncpa [#allocation6], 0 }
   0x2   :  { %15 = vsyncpa [#allocation4], 0 }
   0x3   :  { %17 = vsyncpa [#allocation4 + $0x1], 0  ;;  %s1340_s27 = smov 0   ;;  %s1342_s28 = smov 0  }
   0x4   :  { %s1344_s29 = smov 0   ;;  %s1346_s30 = smov 0  }
   0x5 LB: > { %s1361_s9 = sadd.s32 4294967295, %s1278_s30   ;;  %s1008_s10 = sadd.s32 4294967294, %s1278_s30   ;;  %s1278_s30 = sphi %s1346_s30, %s1819_s30   ;;  %s1274_s29 = sphi %s1344_s29, %s1818_s29   ;;  %s1270_s28 = sphi %s1342_s28, %s1817_s28   ;;  %s1266_s27 = sphi %s1340_s27, %s1816_s27  }
   0x6   : > { %s1365_s11 = sadd.s32 1, %s1278_s30   ;;  %s203_s12 = sadd.s32 1, %s1274_s29 }
   0x7   : > { %s200_s13 = ssub.s32 %s1278_s30, %s1365_s11  ;;  %p213_p0 = scmp.ne.s32.totalorder %s1274_s29, %s1270_s28 }
   0x8   : > { %p201_p1 = scmp.eq.s32.totalorder %s200_s13, 0  ;;  %p214_p2 = scmp.eq.s32.totalorder %s1361_s9, 1 }
   0x9   : > { %p219_p3 = scmp.ne.s32.totalorder %s1270_s28, %s1266_s27  ;;  %p220_p4 = scmp.eq.s32.totalorder %s1008_s10, 1 }
   0xa   : > { %s1376_s14 = scalar_select %p201_p1, %s1274_s29, %s203_s12  }
   0xb   : > { %p1378_p5 = por %p214_p2, %p213_p0  ;;  %p1382_p6 = por %p220_p4, %p219_p3 }
   0xc   : > { %p1009_p7 = scmp.ge.s32.totalorder %s1278_s30, 1  ;;  %p227_p8 = scmp.lt.s32.totalorder %s1278_s30, 3 }
   0xd   : > { %s1804_s15 = scalar_select %p1378_p5, 1, 0 }
   0xe   : > { %s1805_s16 = scalar_select %p1382_p6, 1, 0 }
   0xf   : > { %p1799_p9 = scmp.eq.s32.totalorder %s1361_s9, 0  ;;  %p1389_p10 = pnand %p1009_p7, %p227_p8 }
  0x10   : > { %s1280_s18 = smov [#allocation2]   ;;  %s1281_s20 = smov [#allocation5]  }
  0x11   : > { %s1806_s17 = scalar_select %p1389_p10, 1, 0 }
  0x12   : > { %s246_s19 = sshll.u32 %s1280_s18, 4  ;;  %p1079_p11 = pneg %p1389_p10  ;;  %s247_s19 = int_to_ptr.vmem [resolvable:$true] %s246_s19 }
  0x13   : > { %s263_s21 = sshll.u32 %s1281_s20, 4  ;;  %s1152_s25 = scalar_lea.hbm %s1793_s3, 128  ;;  %s1401_s21 = int_to_ptr.vmem [resolvable:$true] %s263_s21 }
  0x14   : > { %p1397_p12 = pnand %p1799_p9, %p1079_p11  ;;  %p1153_p13 = scmp.ne.s32.totalorder %s1793_s3, %s1152_s25 }
  0x15   : > { %p1159_p3 = scmp.lt.u32.totalorder %s1152_s25, %s1793_s3 }
  0x16   : > { %p1154_p0 = pneg %p1397_p12 }
  0x18   : > { %p1155_p1 = pnand %p1154_p0, %p1153_p13 }
  0x1a   : > { %p1156_p2 = pneg %p1155_p1 }
  0x1c   : > { %p1161_p4 = pnand %p1159_p3, %p1156_p2 }
  0x1e   : > { %1164 = shalt.err (!%p1161_p4)
}
  0x1f   : > { %s1165_s18 = scalar_lea.vmem %s247_s19, 128  ;;  %p1173_p9 = scmp.lt.s32.totalorder %s247_s19, %s247_s19 }
  0x20   : > { %p1166_p7 = scmp.ne.s32.totalorder %s247_s19, %s1165_s18  ;;  %p1174_p6 = scmp.lt.s32.totalorder %s1165_s18, %s1165_s18 }
  0x22   : > { %p1168_p8 = pnand %p1166_p7, %p1154_p0  ;;  %p1175_p5 = por %p1174_p6, %p1173_p9 }
  0x24   : > { %p1169_p11 = pneg %p1168_p8 }
  0x26   : > { %p1176_p10 = pnand %p1175_p5, %p1169_p11 }
  0x28   : > { %1179 = shalt.err (!%p1176_p10)
}
  0x29   : > { %1082 = dma.hbm_to_vmem [thread:$0]  (!%p1397_p12), %s1793_s3, 128, %s247_s19, [#allocation3]  }
  0x2a   : > { %s1180_s26 = scalar_lea.hbm %s1796_s6, 128 }
  0x2b   : > { %p1181_p13 = scmp.ne.s32.totalorder %s1796_s6, %s1180_s26  ;;  %p1187_p9 = scmp.lt.u32.totalorder %s1180_s26, %s1796_s6 }
  0x2d   : > { %p1183_p6 = pnand %p1181_p13, %p1154_p0 }
  0x2f   : > { %p1184_p5 = pneg %p1183_p6 }
  0x31   : > { %p1189_p10 = pnand %p1187_p9, %p1184_p5 }
  0x33   : > { %1192 = shalt.err (!%p1189_p10)
}
  0x34   : > { %s1193_s19 = scalar_lea.vmem %s1401_s21, 128  ;;  %p1201_p4 = scmp.lt.s32.totalorder %s1401_s21, %s1401_s21 }
  0x35   : > { %p1194_p1 = scmp.ne.s32.totalorder %s1401_s21, %s1193_s19  ;;  %p1202_p7 = scmp.lt.s32.totalorder %s1193_s19, %s1193_s19 }
  0x37   : > { %p1196_p2 = pnand %p1194_p1, %p1154_p0  ;;  %p1203_p8 = por %p1202_p7, %p1201_p4 }
  0x39   : > { %p1197_p3 = pneg %p1196_p2 }
  0x3b   : > { %p1204_p11 = pnand %p1203_p8, %p1197_p3 }
  0x3d   : > { %1207 = shalt.err (!%p1204_p11)
}
  0x3e   : > { %1085 = dma.hbm_to_vmem [thread:$0]  (!%p1397_p12), %s1796_s6, 128, %s1401_s21, [#allocation6]  }
  0x3f   : > { %p1808_p13 = scmp.ne.s32.totalorder %s1806_s17, 0 }
  0x40   : > { %p1809_p6 = scmp.eq.s32.totalorder (!%p1808_p13), %s1361_s9, 0 }
  0x41   : > { %287 = sbr.rel (%p1808_p13) target bundleno = 1017 (0x3f9), region = 52 }
  0x48   : > { %1253 = dma.done.wait (%p1809_p6), [#allocation3], 128   ;;  %p1810_p0 = pmov %p1809_p6 }
  0x4a   : > { %1255 = vsyncadd (%p1810_p0), [#allocation3], 4294967168  ;;  %p1811_p5 = pmov %p1810_p0 }
  0x4b   : > { %p1812_p9 = pmov %p1810_p0 }
  0x4c   : > { %1257 = dma.done.wait (%p1811_p5), [#allocation6], 128  }
  0x4d   : > { %1259 = vsyncadd (%p1812_p9), [#allocation6], 4294967168  ;;  %v1282_v0 = vmov 0   ;;  %v331_v1 = vld [vmem:[%s1791_s1] sm:$0xf]  ;;  %p325_p12 = scmp.lt.s32.totalorder %s1361_s9, 1  ;;  %v395_v45 = vlaneseq }
  0x4e   : > { %1141 = vset.pattern.permute.xlu0 %v1282_v0  ;;  %1142 = vset.pattern.permute.xlu1 %v1282_v0  ;;  %v332_v2 = vld [vmem:[%s1792_s2] sm:$0xf]  ;;  %vm336_vm0 = vcmask 1043456   ;;  %v1283_v43 = vmov 839922192   ;;  %s1284_s18 = smov 1  }
  0x4f   : > { %390 = vperm.xlu0 %1141, %v331_v1   ;;  %s326_s25 = scalar_select %p325_p12, %s1361_s9, 1  ;;  %v393_v44 = vunpack.c.l.s4 %v1283_v43  ;;  %v396_v48 = vshrl.u32 %v395_v45, 7  ;;  %v709_v61 = vld [vmem:[%s1794_s4] sm:$0xff]  ;;  %v1292_v62 = vmov 0.0   ;;  %vm628_vm9 = vcmask 293888  }
  0x50   : > { %s1285_s19 = smov 16   ;;  %s1286_s20 = smov 17   ;;  %702 = vmatprep.mubr.f32.mxu0 %v1292_v62  ;;  %903 = vmatprep.mubr.f32.mxu1 %v1292_v62  ;;  %v710_v63 = vld [vmem:[%s1795_s5] sm:$0xff]  ;;  %vm1293_vm10 = vmmov 1   ;;  %vm831_vm12 = vcmask 621568  }
  0x51   : > { %s1037_s26 = sshll.u32 %s326_s25, 3  ;;  %v394_v47 = vunpack.c.0.s8 %v393_v44  ;;  %s1287_s23 = smov 15   ;;  %v1023_v62 = vld [vmem:[%s1797_s7 + $0x6] ss:$8 sm:$0x3]  ;;  %vm1064_vm11 = vmpackc.low %vm336_vm0, %vm1293_vm10 }
  0x52   : > { %s329_s13 = scalar_lea.vmem %s1790_s0, %s1037_s26  ;;  %s1288_s21 = smov 127  }
  0x53   : > { %403 = vperm.xlu0 %1141, %v332_v2   ;;  %v330_v3 = vld [vmem:[%s329_s13] sm:$0xff]  ;;  %v397_v50 = vsub.s32 %v394_v47, %v396_v48  ;;  %s1289_s17 = smov 112   ;;  %s1290_s22 = smov 113   ;;  %v1519_v2 = vand.u32 127, %v395_v45 }
  0x54   : > { %v334_v4 = vcombine.high %v330_v3, %v330_v3  ;;  %v337_v5 = vsel %vm336_vm0, %v330_v3, 0.0  ;;  %s1802_s24 = smov 111   ;;  %v1024_v47 = vld [vmem:[%s1797_s7 + $0x7] ss:$8 sm:$0x3]  ;;  %p1814_p1 = scmp.ne.s32.totalorder %s1804_s15, 0 }
  0x55   : > { %v338_v7 = vrot.slane %v337_v5, 4  ;;  %vm445_vm1 = vcmp.lt.s32.totalorder %v1519_v2, 16  ;;  %vm489_vm2 = vcmp.lt.s32.totalorder %v1519_v2, 1  ;;  %vm424_vm3 = vcmp.lt.s32.totalorder %v1519_v2, 17 }
  0x56   : > { %v344_v6 = vsel %vm336_vm0, %v334_v4, 0.0  ;;  %vm467_vm4 = vcmp.lt.s32.totalorder %v1519_v2, 15  ;;  %vm511_vm5 = vcmp.lt.s32.totalorder %v1519_v2, 127  ;;  %vm555_vm6 = vcmp.lt.s32.totalorder %v1519_v2, 112 }
  0x57   : > { %v345_v8 = vrot.slane %v344_v6, 4  ;;  %v339_v9 = vadd.f32 %v338_v7, %v337_v5  ;;  %v1521_v5 = vsub.s32 0, %v396_v48  ;;  %v1019_v7 = vld [vmem:[%s1797_s7 + $0x1] ss:$8 sm:$0x3]  ;;  %vm533_vm7 = vcmp.lt.s32.totalorder %v1519_v2, 113 }
  0x58   : > { %vm577_vm8 = vcmp.lt.s32.totalorder %v1519_v2, 111 }
  0x59   : > { %v346_v10 = vadd.f32 %v345_v8, %v344_v6  ;;  %v340_v11 = vrot.slane %v339_v9, 2  ;;  %v1523_v6 = vsub.s32 1, %v396_v48  ;;  %v1021_v8 = vld [vmem:[%s1797_s7 + $0x3] ss:$8 sm:$0x3] }
  0x5b   : > { %v347_v12 = vrot.slane %v346_v10, 2  ;;  %v341_v13 = vadd.f32 %v340_v11, %v339_v9  ;;  %v1534_v11 = vrot.slane %v1019_v7, %v1521_v5 }
  0x5d   : > { %v348_v14 = vadd.f32 %v347_v12, %v346_v10  ;;  %v342_v15 = vrot.slane %v341_v13, 1  ;;  %v1537_v12 = vrot.slane %v1019_v7, %v1523_v6 }
  0x5f   : > { %v349_v16 = vrot.slane %v348_v14, 1  ;;  %v343_v17 = vadd.f32 %v342_v15, %v341_v13  ;;  %v1540_v13 = vrot.slane %v1021_v8, %v1521_v5 }
  0x61   : > { %v350_v18 = vadd.f32 %v349_v16, %v348_v14  ;;  %v352_v19 = vmul.f32 0.25, %v343_v17  ;;  %v427_v14 = vld [vmem:[%s1797_s7] ss:$8 sm:$0x3]  ;;  %v1550_v17 = vrot.slane %v1021_v8, %v1523_v6 }
  0x63   : > { %v353_v20 = vmul.f32 0.25, %v350_v18 }
  0x65   : > { %v356_v21 = vcombine.low %v352_v19, %v353_v20  ;;  %v1020_v20 = vld [vmem:[%s1797_s7 + $0x2] ss:$8 sm:$0x3] }
  0x67   : > { %v358_v22 = vsub.f32 %v330_v3, %v356_v21  ;;  %v1561_v21 = vrot.slane %v427_v14, %v1521_v5 }
  0x69   : > { %v359_v23 = vmul.f32 %v358_v22, %v358_v22 }
  0x6b   : > { %v361_v24 = vcombine.high %v359_v23, %v359_v23  ;;  %v363_v25 = vsel %vm336_vm0, %v359_v23, 0.0 }
  0x6c   : > { %v364_v27 = vrot.slane %v363_v25, 4 }
  0x6d   : > { %v370_v26 = vsel %vm336_vm0, %v361_v24, 0.0 }
  0x6e   : > { %v371_v28 = vrot.slane %v370_v26, 4  ;;  %v365_v29 = vadd.f32 %v364_v27, %v363_v25 }
  0x70   : > { %v372_v30 = vadd.f32 %v371_v28, %v370_v26  ;;  %v366_v31 = vrot.slane %v365_v29, 2 }
  0x72   : > { %v373_v32 = vrot.slane %v372_v30, 2  ;;  %v367_v33 = vadd.f32 %v366_v31, %v365_v29  ;;  %v1576_v31 = vrot.slane %v1020_v20, %v1521_v5 }
  0x74   : > { %v374_v34 = vadd.f32 %v373_v32, %v372_v30  ;;  %v368_v35 = vrot.slane %v367_v33, 1  ;;  %v1579_v32 = vrot.slane %v1020_v20, %v1523_v6 }
  0x76   : > { %v375_v36 = vrot.slane %v374_v34, 1  ;;  %v369_v37 = vadd.f32 %v368_v35, %v367_v33 }
  0x78   : > { %v376_v38 = vadd.f32 %v375_v36, %v374_v34  ;;  %v377_v39 = vmul.f32 0.25, %v369_v37  ;;  %v1022_v36 = vld [vmem:[%s1797_s7 + $0x5] ss:$8 sm:$0x3] }
  0x79   : > { %v1594_v45 = vrot.slane %v1022_v36, %v1521_v5 }
  0x7a   : > { %v378_v40 = vmul.f32 0.25, %v376_v38  ;;  %v379_v41 = vadd.f32 1e-05, %v377_v39 }
  0x7c   : > { %v380_v42 = vadd.f32 1e-05, %v378_v40  ;;  %1144 = vrsqrt.f32 %v379_v41 }
  0x7e   : > { %1146 = vrsqrt.f32 %v380_v42 }
  0x86   : > { %v1145_v46 = vpop.eup %1144 }
  0x88   : > { %v1147_v49 = vpop.eup %1146 }
  0x89   : > { %v385_v51 = vcombine.low %v1145_v46, %v1147_v49  ;;  %v1597_v46 = vrot.slane %v1022_v36, %v1523_v6 }
  0x8b   : > { %v387_v53 = vmul.f32 %v385_v51, %v358_v22  ;;  %v1564_v22 = vrot.slane %v427_v14, %v1523_v6  ;;  %v1633_v14 = vrot.slane %v1023_v62, %v1523_v6 }
  0xce   : > { %v391_v52 = vpop.permute.xlu0 %390 }
  0xcf   : > { %v398_v54 = vrot.slane %v391_v52, %v397_v50 }
  0xd1   : > { %v400_v56 = vmul.f32 %v398_v54, %v387_v53 }
  0xd2   : > { %v404_v55 = vpop.permute.xlu0 %403 }
  0xd3   : > { %v411_v57 = vrot.slane %v404_v55, %v397_v50 }
  0xd5   : > { %v413_v58 = vadd.f32 %v411_v57, %v400_v56 }
  0xd7   : > { %v1475_v59 = vmax.f32 %v413_v58, 0.0  ;;  %v1612_v58 = vrot.slane %v1024_v47, %v1521_v5 }
  0xd9   : > { %485 = vrot.lane.b32.xlu0 %v1475_v59, %s1284_s18  ;;  %441 = vrot.lane.b32.xlu1 %v1475_v59, %s1285_s19  ;;  %v1483_v60 = vcombine.high %v1475_v59, %v1475_v59 }
  0xdd   : > { %418 = vrot.lane.b32.xlu0 %v1475_v59, %s1286_s20  ;;  %443 = vrot.lane.b32.xlu1 %v1483_v60, %s1285_s19 }
  0xe1   : > { %463 = vrot.lane.b32.xlu0 %v1475_v59, %s1287_s23  ;;  %487 = vrot.lane.b32.xlu1 %v1483_v60, %s1284_s18 }
  0xe5   : > { %507 = vrot.lane.b32.xlu0 %v1475_v59, %s1288_s21  ;;  %420 = vrot.lane.b32.xlu1 %v1483_v60, %s1286_s20 }
  0xe9   : > { %551 = vrot.lane.b32.xlu0 %v1475_v59, %s1289_s17  ;;  %465 = vrot.lane.b32.xlu1 %v1483_v60, %s1287_s23 }
  0xed   : > { %529 = vrot.lane.b32.xlu0 %v1475_v59, %s1290_s22  ;;  %509 = vrot.lane.b32.xlu1 %v1483_v60, %s1288_s21 }
  0xf1   : > { %573 = vrot.lane.b32.xlu0 %v1475_v59, %s1802_s24  ;;  %553 = vrot.lane.b32.xlu1 %v1483_v60, %s1289_s17 }
  0xf5   : > { %752 = vperm.xlu0 %1141, %v709_v61   ;;  %531 = vrot.lane.b32.xlu1 %v1483_v60, %s1290_s22  ;;  %v1615_v61 = vrot.slane %v1024_v47, %v1523_v6 }
  0xf9   : > { %575 = vrot.lane.b32.xlu1 %v1483_v60, %s1802_s24 }
  0xfd   : > { %759 = vperm.xlu1 %1142, %v710_v63  }
 0x14b   : > { %v486_v0 = vpop.permute.xlu0 %485  ;;  %v442_v1 = vpop.permute.xlu1 %441 }
 0x14f   : > { %v419_v3 = vpop.permute.xlu0 %418  ;;  %v444_v4 = vpop.permute.xlu1 %443 }
 0x150   : > { %v446_v15 = vsel %vm445_vm1, %v442_v1, %v444_v4  ;;  %v447_v16 = vsel %vm445_vm1, %v444_v4, %v442_v1 }
 0x151   : > { %v461_v24 = vmul.f32 %v1534_v11, %v447_v16  ;;  %v462_v25 = vmul.f32 %v1537_v12, %v446_v15  ;;  %v1025_v15 = vld [vmem:[%s1797_s7 + $0x10] ss:$8 sm:$0x3] }
 0x153   : > { %v464_v9 = vpop.permute.xlu0 %463  ;;  %v488_v10 = vpop.permute.xlu1 %487  ;;  %v597_v37 = vrot.slane %v461_v24, 4  ;;  %v598_v38 = vrot.slane %v462_v25, 4  ;;  %v1644_v24 = vrot.slane %v1025_v15, %v1523_v6 }
 0x154   : > { %v490_v18 = vsel %vm489_vm2, %v486_v0, %v488_v10  ;;  %v491_v19 = vsel %vm489_vm2, %v488_v10, %v486_v0  ;;  %v1630_v10 = vrot.slane %v1023_v62, %v1521_v5 }
 0x155   : > { %v505_v28 = vmul.f32 %v1540_v13, %v491_v19  ;;  %v506_v29 = vmul.f32 %v1550_v17, %v490_v18 }
 0x157   : > { %v421_v23 = vpop.permute.xlu1 %420  ;;  %v508_v30 = vpop.permute.xlu0 %507  ;;  %v603_v41 = vrot.slane %v505_v28, 4  ;;  %v604_v42 = vrot.slane %v506_v29, 4 }
 0x158   : > { %v425_v26 = vsel %vm424_vm3, %v419_v3, %v421_v23  ;;  %v426_v27 = vsel %vm424_vm3, %v421_v23, %v419_v3 }
 0x159   : > { %v439_v33 = vmul.f32 %v1561_v21, %v426_v27  ;;  %v440_v34 = vmul.f32 %v1564_v22, %v425_v26 }
 0x15b   : > { %v466_v35 = vpop.permute.xlu1 %465  ;;  %v552_v48 = vpop.permute.xlu0 %551  ;;  %v620_v50 = vsel %vm336_vm0, %v440_v34, %v598_v38  ;;  %v619_v52 = vsel %vm336_vm0, %v439_v33, %v597_v37 }
 0x15c   : > { %v468_v39 = vsel %vm467_vm4, %v464_v9, %v466_v35  ;;  %v469_v40 = vsel %vm467_vm4, %v466_v35, %v464_v9 }
 0x15d   : > { %v483_v43 = vmul.f32 %v1576_v31, %v469_v40  ;;  %v484_v44 = vmul.f32 %v1579_v32, %v468_v39  ;;  %v1657_v39 = vrot.slane %v1025_v15, %v1521_v5 }
 0x15f   : > { %v510_v49 = vpop.permute.xlu1 %509  ;;  %v622_v51 = vsel %vm336_vm0, %v484_v44, %v604_v42  ;;  %v621_v53 = vsel %vm336_vm0, %v483_v43, %v603_v41  ;;  %v530_v7 = vpop.permute.xlu0 %529  ;;  %v627_v43 = vld [vmem:[#allocation2] sm:$0xff] }
 0x160   : > { %v512_v54 = vsel %vm511_vm5, %v508_v30, %v510_v49  ;;  %v513_v55 = vsel %vm511_vm5, %v510_v49, %v508_v30  ;;  %v1039_v56 = vpack.c.bf16 %v622_v51, %v620_v50  ;;  %v1041_v57 = vpack.c.bf16 %v621_v53, %v619_v52 }
 0x161   : > { %v527_v63 = vmul.f32 %v1594_v45, %v512_v54  ;;  %v528_v0 = vmul.f32 %v1597_v46, %v513_v55 }
 0x162   : > { %1040 = vmatprep.subr.bf16.mxu0 %v1039_v56 }
 0x163   : > { %1042 = vmatpush1.bf16.msra.mxu0 %v1041_v57  ;;  %v554_v1 = vpop.permute.xlu1 %553  ;;  %v609_v16 = vrot.slane %v527_v63, 4  ;;  %v610_v18 = vrot.slane %v528_v0, 4  ;;  %v574_v29 = vpop.permute.xlu0 %573 }
 0x164   : > { %v556_v3 = vsel %vm555_vm6, %v552_v48, %v554_v1  ;;  %v557_v4 = vsel %vm555_vm6, %v554_v1, %v552_v48 }
 0x165   : > { %v571_v8 = vmul.f32 %v1612_v58, %v556_v3  ;;  %v572_v9 = vmul.f32 %v1615_v61, %v557_v4  ;;  %v624_v33 = vsel %vm336_vm0, %v1483_v60, %v610_v18  ;;  %v623_v35 = vsel %vm336_vm0, %v1475_v59, %v609_v16 }
 0x167   : > { %v532_v19 = vpop.permute.xlu1 %531  ;;  %v615_v25 = vrot.slane %v571_v8, 4  ;;  %v616_v26 = vrot.slane %v572_v9, 4 }
 0x168   : > { %v534_v20 = vsel %vm533_vm7, %v530_v7, %v532_v19  ;;  %v535_v23 = vsel %vm533_vm7, %v532_v19, %v530_v7 }
 0x169   : > { %v549_v27 = vmul.f32 %v1630_v10, %v534_v20  ;;  %v550_v28 = vmul.f32 %v1633_v14, %v535_v23 }
 0x16b   : > { %v576_v30 = vpop.permute.xlu1 %575  ;;  %v626_v34 = vsel %vm336_vm0, %v550_v28, %v616_v26  ;;  %v625_v36 = vsel %vm336_vm0, %v549_v27, %v615_v25 }
 0x16c   : > { %v579_v6 = vsel %vm577_vm8, %v576_v30, %v574_v29  ;;  %v1043_v37 = vpack.c.bf16 %v626_v34, %v624_v33  ;;  %v1045_v38 = vpack.c.bf16 %v625_v36, %v623_v35  ;;  %v578_v41 = vsel %vm577_vm8, %v574_v29, %v576_v30 }
 0x16d   : > { %v594_v40 = vmul.f32 %v1644_v24, %v579_v6  ;;  %v593_v42 = vmul.f32 %v1657_v39, %v578_v41 }
 0x16e   : > { %1044 = vmatprep.subr.bf16.mxu0 %v1043_v37 }
 0x16f   : > { %1046 = vmatpush1.bf16.msra.mxu0 %v1045_v38 }
 0x170   : > { %1026 = vmatprep.subr.msk.mxu0 %vm336_vm0, %v594_v40 }
 0x173   : > { %1027 = vmatpush1.msk.msra.mxu0 %vm336_vm0, %v593_v42 }
 0x174   : > { %1028 = vmatmul.mubr.msk.f32.vlgmr.msra.gmra.mrb[0].mxu0 %vm628_vm9, %v627_v43  ;;  %v753_v37 = vpop.permute.xlu0 %752 }
 0x17c   : > { %v760_v40 = vpop.permute.xlu1 %759 }
 0x247   : > { %v704_v44 = vpop.f32.mrb[0].mxu0 }
 0x248   : > { %v711_v47 = vrot.slane %v704_v44, 4  ;;  %v706_v5 = vpop.f32.mrb[1].mxu0 }
 0x249   : > { %v717_v48 = vrot.slane %v706_v5, 4 }
 0x24a   : > { %v712_v49 = vadd.f32 %v711_v47, %v704_v44 }
 0x24b   : > { %v718_v50 = vadd.f32 %v717_v48, %v706_v5 }
 0x24c   : > { %v713_v51 = vrot.slane %v712_v49, 2 }
 0x24d   : > { %v719_v52 = vrot.slane %v718_v50, 2 }
 0x24e   : > { %v714_v53 = vadd.f32 %v713_v51, %v712_v49 }
 0x24f   : > { %v720_v54 = vadd.f32 %v719_v52, %v718_v50 }
 0x250   : > { %v715_v55 = vrot.slane %v714_v53, 1 }
 0x251   : > { %v721_v56 = vrot.slane %v720_v54, 1 }
 0x252   : > { %v716_v57 = vadd.f32 %v715_v55, %v714_v53 }
 0x253   : > { %v722_v62 = vadd.f32 %v721_v56, %v720_v54 }
 0x254   : > { %v724_v63 = vmul.f32 0.125, %v716_v57 }
 0x255   : > { %v725_v0 = vmul.f32 0.125, %v722_v62 }
 0x256   : > { %v726_v1 = vsub.f32 %v704_v44, %v724_v63 }
 0x257   : > { %v727_v3 = vsub.f32 %v706_v5, %v725_v0 }
 0x258   : > { %v728_v4 = vmul.f32 %v726_v1, %v726_v1 }
 0x259   : > { %v729_v7 = vmul.f32 %v727_v3, %v727_v3 }
 0x25a   : > { %v730_v8 = vrot.slane %v728_v4, 4 }
 0x25b   : > { %v736_v9 = vrot.slane %v729_v7, 4 }
 0x25c   : > { %v731_v15 = vadd.f32 %v730_v8, %v728_v4 }
 0x25d   : > { %v737_v16 = vadd.f32 %v736_v9, %v729_v7 }
 0x25e   : > { %v732_v18 = vrot.slane %v731_v15, 2 }
 0x25f   : > { %v738_v19 = vrot.slane %v737_v16, 2 }
 0x260   : > { %v733_v20 = vadd.f32 %v732_v18, %v731_v15 }
 0x261   : > { %v739_v23 = vadd.f32 %v738_v19, %v737_v16 }
 0x262   : > { %v734_v25 = vrot.slane %v733_v20, 1 }
 0x263   : > { %v740_v26 = vrot.slane %v739_v23, 1 }
 0x264   : > { %v735_v27 = vadd.f32 %v734_v25, %v733_v20 }
 0x265   : > { %v741_v28 = vadd.f32 %v740_v26, %v739_v23 }
 0x266   : > { %v742_v29 = vmul.f32 0.125, %v735_v27 }
 0x267   : > { %v743_v30 = vmul.f32 0.125, %v741_v28 }
 0x268   : > { %v744_v33 = vadd.f32 1e-05, %v742_v29 }
 0x269   : > { %v745_v34 = vadd.f32 1e-05, %v743_v30 }
 0x26a   : > { %1148 = vrsqrt.f32 %v744_v33 }
 0x26b   : > { %1150 = vrsqrt.f32 %v745_v34 }
 0x274   : > { %v1149_v35 = vpop.eup %1148 }
 0x275   : > { %v1151_v36 = vpop.eup %1150  ;;  %v748_v6 = vmul.f32 %v1149_v35, %v726_v1 }
 0x276   : > { %v749_v38 = vmul.f32 %v1151_v36, %v727_v3 }
 0x277   : > { %v755_v41 = vmul.f32 %v753_v37, %v748_v6 }
 0x278   : > { %v756_v42 = vmul.f32 %v753_v37, %v749_v38 }
 0x279   : > { %v762_v43 = vadd.f32 %v760_v40, %v755_v41 }
 0x27a   : > { %v763_v44 = vadd.f32 %v760_v40, %v756_v42 }
 0x27b   : > { %v1665_v47 = vmax.f32 %v762_v43, 0.0 }
 0x27c   : > { %v765_v5 = vmax.f32 %v763_v44, 0.0 }
 0x27d   : > { %766 = vrot.lane.b32.xlu0 %v1665_v47, %s1286_s20 }
 0x27e   : > { %768 = vrot.lane.b32.xlu1 %v765_v5, %s1286_s20 }
 0x281   : > { %774 = vrot.lane.b32.xlu0 %v1665_v47, %s1285_s19 }
 0x282   : > { %776 = vrot.lane.b32.xlu1 %v765_v5, %s1285_s19  ;;  %s1813_s19 = smov 111  }
 0x285   : > { %782 = vrot.lane.b32.xlu0 %v1665_v47, %s1287_s23 }
 0x286   : > { %784 = vrot.lane.b32.xlu1 %v765_v5, %s1287_s23 }
 0x289   : > { %790 = vrot.lane.b32.xlu0 %v1665_v47, %s1284_s18 }
 0x28a   : > { %792 = vrot.lane.b32.xlu1 %v765_v5, %s1284_s18  ;;  %s322_s18 = sand.u32 1, %s1270_s28  }
 0x28b   : > { %s1016_s20 = sshll.u32 %s322_s18, 4  ;;  %s913_s24 = scalar_lea.sflag [#allocation4], %s322_s18 }
 0x28c   : > { %s324_s23 = scalar_lea.vmem [#allocation7], %s1016_s20 }
 0x28d   : > { %798 = vrot.lane.b32.xlu0 %v1665_v47, %s1288_s21 }
 0x28e   : > { %800 = vrot.lane.b32.xlu1 %v765_v5, %s1288_s21  ;;  %s927_s21 = sshll.u32 %s324_s23, 4  ;;  %s1745_s21 = int_to_ptr.vmem [resolvable:$true] %s927_s21 }
 0x28f   : > { %s1208_s13 = scalar_lea.vmem %s1745_s21, 256 }
 0x290   : > { %p1209_p10 = scmp.ne.s32.totalorder %s1745_s21, %s1208_s13 }
 0x291   : > { %806 = vrot.lane.b32.xlu0 %v1665_v47, %s1290_s22 }
 0x292   : > { %808 = vrot.lane.b32.xlu1 %v765_v5, %s1290_s22  ;;  %p1210_p2 = pnand %p1209_p10, %p1814_p1 }
 0x294   : > { %p1211_p3 = pneg %p1210_p2 }
 0x295   : > { %814 = vrot.lane.b32.xlu0 %v1665_v47, %s1289_s17 }
 0x296   : > { %816 = vrot.lane.b32.xlu1 %v765_v5, %s1289_s17  ;;  %s1038_s17 = sshll.u32 %s1361_s9, 8  ;;  %s1294_s9 = smov [#allocation7]  }
 0x297   : > { %s1750_s12 = scalar_lea.hbm %s1798_s8, %s1038_s17  ;;  %s1212_s25 = sshll.u32 %s1294_s9, 4  ;;  %s1213_s25 = int_to_ptr.vmem [resolvable:$false] %s1212_s25 }
 0x298   : > { %s1214_s26 = scalar_lea.vmem %s1213_s25, 512  ;;  %p1215_p4 = scmp.lt.s32.totalorder %s1745_s21, %s1213_s25 }
 0x299   : > { %822 = vrot.lane.b32.xlu0 %v1665_v47, %s1813_s19  ;;  %p1216_p7 = scmp.lt.s32.totalorder %s1214_s26, %s1208_s13 }
 0x29a   : > { %824 = vrot.lane.b32.xlu1 %v765_v5, %s1813_s19 }
 0x29b   : > { %p1217_p8 = por %p1216_p7, %p1215_p4 }
 0x29d   : > { %p1218_p11 = pnand %p1217_p8, %p1211_p3 }
 0x2ef   : > { %v767_v48 = vpop.permute.xlu0 %766 }
 0x2f0   : > { %v769_v49 = vpop.permute.xlu1 %768 }
 0x2f1   : > { %v770_v50 = vsel %vm424_vm3, %v767_v48, %v769_v49  ;;  %v771_v51 = vsel %vm424_vm3, %v769_v49, %v767_v48 }
 0x2f2   : > { %v772_v56 = vmul.f32 %v771_v51, %v1561_v21  ;;  %v773_v62 = vmul.f32 %v770_v50, %v1564_v22 }
 0x2f3   : > { %v775_v52 = vpop.permute.xlu0 %774 }
 0x2f4   : > { %v777_v53 = vpop.permute.xlu1 %776 }
 0x2f5   : > { %v778_v54 = vsel %vm445_vm1, %v775_v52, %v777_v53  ;;  %v779_v55 = vsel %vm445_vm1, %v777_v53, %v775_v52 }
 0x2f6   : > { %v780_v57 = vmul.f32 %v779_v55, %v1534_v11  ;;  %v781_v63 = vmul.f32 %v778_v54, %v1537_v12 }
 0x2f7   : > { %v783_v0 = vpop.permute.xlu0 %782 }
 0x2f8   : > { %v785_v1 = vpop.permute.xlu1 %784  ;;  %v1047_v3 = vpack.c.bf16 %v781_v63, %v773_v62  ;;  %v1049_v4 = vpack.c.bf16 %v780_v57, %v772_v56 }
 0x2f9   : > { %v786_v7 = vsel %vm467_vm4, %v783_v0, %v785_v1  ;;  %v787_v8 = vsel %vm467_vm4, %v785_v1, %v783_v0 }
 0x2fa   : > { %1048 = vmatprep.subr.bf16.mxu1 %v1047_v3  ;;  %v788_v22 = vmul.f32 %v787_v8, %v1576_v31  ;;  %v789_v15 = vmul.f32 %v786_v7, %v1579_v32 }
 0x2fb   : > { %1050 = vmatpush1.bf16.msra.mxu1 %v1049_v4  ;;  %v791_v9 = vpop.permute.xlu0 %790 }
 0x2fc   : > { %v793_v21 = vpop.permute.xlu1 %792 }
 0x2fd   : > { %v794_v11 = vsel %vm489_vm2, %v791_v9, %v793_v21  ;;  %v795_v12 = vsel %vm489_vm2, %v793_v21, %v791_v9 }
 0x2fe   : > { %v796_v16 = vmul.f32 %v795_v12, %v1540_v13  ;;  %v797_v18 = vmul.f32 %v794_v11, %v1550_v17 }
 0x2ff   : > { %v799_v19 = vpop.permute.xlu0 %798 }
 0x300   : > { %v801_v20 = vpop.permute.xlu1 %800  ;;  %v1051_v23 = vpack.c.bf16 %v797_v18, %v789_v15  ;;  %v1053_v25 = vpack.c.bf16 %v796_v16, %v788_v22 }
 0x301   : > { %v802_v26 = vsel %vm511_vm5, %v799_v19, %v801_v20  ;;  %v803_v27 = vsel %vm511_vm5, %v801_v20, %v799_v19 }
 0x302   : > { %v804_v28 = vmul.f32 %v802_v26, %v1594_v45  ;;  %v805_v31 = vmul.f32 %v803_v27, %v1597_v46  ;;  %1052 = vmatprep.subr.bf16.mxu1 %v1051_v23 }
 0x303   : > { %1054 = vmatpush1.bf16.msra.mxu1 %v1053_v25  ;;  %v807_v32 = vpop.permute.xlu0 %806 }
 0x304   : > { %v809_v13 = vpop.permute.xlu1 %808  ;;  %v1055_v29 = vpack.c.bf16 %v805_v31, %v765_v5  ;;  %v1057_v17 = vpack.c.bf16 %v804_v28, %v1665_v47 }
 0x305   : > { %v810_v30 = vsel %vm533_vm7, %v807_v32, %v809_v13  ;;  %v811_v33 = vsel %vm533_vm7, %v809_v13, %v807_v32 }
 0x306   : > { %1056 = vmatprep.subr.bf16.mxu1 %v1055_v29  ;;  %v812_v36 = vmul.f32 %v810_v30, %v1630_v10  ;;  %v813_v6 = vmul.f32 %v811_v33, %v1633_v14  ;;  %v830_v14 = vld [vmem:[#allocation5] sm:$0xff] }
 0x307   : > { %1058 = vmatpush1.bf16.msra.mxu1 %v1057_v17  ;;  %v815_v34 = vpop.permute.xlu0 %814 }
 0x308   : > { %v817_v35 = vpop.permute.xlu1 %816 }
 0x309   : > { %v818_v45 = vsel %vm555_vm6, %v815_v34, %v817_v35  ;;  %v819_v46 = vsel %vm555_vm6, %v817_v35, %v815_v34 }
 0x30a   : > { %v820_v37 = vmul.f32 %v818_v45, %v1612_v58  ;;  %v821_v38 = vmul.f32 %v819_v46, %v1615_v61 }
 0x30b   : > { %v823_v40 = vpop.permute.xlu0 %822 }
 0x30c   : > { %v825_v41 = vpop.permute.xlu1 %824  ;;  %v1059_v42 = vpack.c.bf16 %v821_v38, %v813_v6  ;;  %v1061_v43 = vpack.c.bf16 %v820_v37, %v812_v36 }
 0x30d   : > { %v826_v44 = vsel %vm577_vm8, %v823_v40, %v825_v41  ;;  %v827_v47 = vsel %vm577_vm8, %v825_v41, %v823_v40 }
 0x30e   : > { %v828_v5 = vmul.f32 %v826_v44, %v1657_v39  ;;  %v829_v10 = vmul.f32 %v827_v47, %v1644_v24  ;;  %1060 = vmatprep.subr.bf16.mxu1 %v1059_v42 }
 0x30f   : > { %1062 = vmatpush1.bf16.msra.mxu1 %v1061_v43 }
 0x310   : > { %v1063_v58 = vpack.c.bf16 %v1483_v60, %v829_v10  ;;  %v1066_v61 = vpack.c.bf16 %v1475_v59, %v828_v5 }
 0x312   : > { %1065 = vmatprep.subr.msk.bf16.mxu1 %vm1064_vm11, %v1063_v58 }
 0x313   : > { %1068 = vmatpush1.bf16.msk.msra.mxu1 %vm1064_vm11, %v1066_v61 }
 0x316   : > { %1031 = vmatmul.mubr.msk.f32.vlgmr.msra.gmra.mrb[0].mxu1 %vm831_vm12, %v830_v14 }
 0x3e9   : > { %v905_v2 = vpop.f32.mrb[0].mxu1 }
 0x3ea   : > { %910 = vst [vmem:[%s324_s23] sm:$0xff] %v905_v2  ;;  %v907_v59 = vpop.f32.mrb[1].mxu1 }
 0x3eb   : > { %911 = vst [vmem:[%s324_s23 + $0x8] sm:$0xff] %v907_v59 }
 0x3ec   : > { %1221 = shalt.err (!%p1218_p11)
}
 0x3ed   : > { %s1222_s19 = scalar_lea.hbm %s1750_s12, 256  ;;  %s1226_s23 = scalar_lea.hbm %s1798_s8, 512 }
 0x3ee   : > { %p1223_p13 = scmp.ne.s32.totalorder %s1750_s12, %s1222_s19  ;;  %p1227_p5 = scmp.lt.u32.totalorder %s1750_s12, %s1798_s8 }
 0x3ef   : > { %p1228_p9 = scmp.lt.u32.totalorder %s1226_s23, %s1222_s19  ;;  %p1230_p10 = scmp.lt.u32.totalorder %s1222_s19, %s1750_s12 }
 0x3f0   : > { %p1224_p6 = pnand %p1223_p13, %p1814_p1 }
 0x3f1   : > { %p1229_p12 = por %p1228_p9, %p1227_p5 }
 0x3f2   : > { %p1225_p0 = pneg %p1224_p6 }
 0x3f3   : > { %p1231_p2 = por %p1230_p10, %p1229_p12 }
 0x3f5   : > { %p1232_p3 = pnand %p1231_p2, %p1225_p0 }
 0x3f7   : > { %1235 = shalt.err (!%p1232_p3)
}
 0x3f8   : > { %1077 = dma.vmem_to_hbm [thread:$0]  (%p1814_p1), %s1745_s21, 256, %s1750_s12, %s913_s24  }
 0x3f9 PF: > { %p1094_p4 = scmp.ge.s32.totalorder %s1278_s30, 2  ;;  %s939_s10 = sand.u32 1, %s1266_s27  }
 0x3fa   : > { %p1815_p7 = scmp.ne.s32.totalorder %s1805_s16, 0  ;;  %s940_s13 = scalar_lea.sflag [#allocation4], %s939_s10 }
 0x3fc   : > { %p1087_p8 = pnand %p1094_p4, %p1815_p7 }
 0x3fe   : > { %1261 = dma.done.wait (!%p1087_p8), %s940_s13, 256  }
 0x3ff   : > { %1263 = vsyncadd (!%p1087_p8), %s940_s13, 4294967040  ;;  %p20_p11 = scmp.ge.s32.totalorder %s1365_s11, 4   ;;  %s1816_s27 = smov %s1270_s28 }
 0x400   : > { %s1817_s28 = smov %s1274_s29  ;;  %s1818_s29 = smov %s1376_s14 }
 0x401   : > { %s1819_s30 = smov %s1365_s11  ;;  %22 = sbr.rel (!%p20_p11) target bundleno = 5 (0x5), region = 103 }
 0x408   :  { %945 = vsyncpa [#allocation3], 1 }
 0x409   :  { %947 = vsyncpa [#allocation3 + $0x1], 1 }
 0x40a   :  { %948 = vsyncpa [#allocation6], 1 }
 0x40b   :  { %949 = vsyncpa [#allocation4], 1 }
 0x40c   :  { %951 = vsyncpa [#allocation4 + $0x1], 1 }

</bundles_post_ra>
